<compile_context>
chip_gen: v7x
topology: tpu7x:2x2x1
jax: 0.10.0
libtpu: 0.0.40
codegen_flags: <defaults>
</compile_context>

<pallas_src>
import functools

import jax
import jax.numpy as jnp
from jax.experimental import pallas as pl
from jax.experimental.pallas import tpu as pltpu


def _dim_reduction_kernel(w_ref, b_ref, x_ref, o_ref):
    # w_ref: SMEM (3,), b_ref: SMEM (1,)
    # x_ref: VMEM (3, TILE_B)   -- batch on the lane axis
    # o_ref: VMEM (1, TILE_B)
    w0 = w_ref[0]
    w1 = w_ref[1]
    w2 = w_ref[2]
    b = b_ref[0]

    x0 = x_ref[0:1, :]          # (1, TILE_B) static-slice views, no copies
    x1 = x_ref[1:2, :]
    x2 = x_ref[2:3, :]

    # VPU multiply-adds; tanh lowers to the EUP slot (co-issues for free).
    y = x0 * w0 + x1 * w1 + x2 * w2 + b
    o_ref[...] = jnp.tanh(y)


@functools.partial(jax.jit, static_argnames=("tile_b",))
def dim_reduction(x, weight, bias, *, tile_b=8192):
    """x: (B, 3) float32; weight: (1, 3) (PyTorch layout); bias: (1,)."""
    B, f_in = x.shape
    assert f_in == 3
    assert tile_b % 128 == 0, "lane tile must be a multiple of 128"

    # Round the batch up so the lane tile is a multiple of 128 and divides it.
    b128 = ((B + 127) // 128) * 128
    tile = min(tile_b, b128)
    b_pad = ((b128 + tile - 1) // tile) * tile
    num_tiles = b_pad // tile

    # Layout plumbing (outside the kernel): batch onto lanes, zero-pad tail.
    x_pad = jnp.pad(x.astype(jnp.float32), ((0, b_pad - B), (0, 0)))
    x_t = x_pad.T                                   # (3, b_pad)
    w = weight.astype(jnp.float32).reshape(3)       # (3,)  SMEM scalars
    b = bias.astype(jnp.float32).reshape(1)         # (1,)  SMEM scalar

    cost = pl.CostEstimate(
        flops=6 * b_pad,                 # 3 mul + 3 add per row
        transcendentals=b_pad,           # one tanh per row
        bytes_accessed=(3 * 4 * b_pad) + (4 * b_pad) + 16,
    )

    out = pl.pallas_call(
        _dim_reduction_kernel,
        out_shape=jax.ShapeDtypeStruct((1, b_pad), jnp.float32),
        grid=(num_tiles,),
        in_specs=[
            pl.BlockSpec(memory_space=pltpu.MemorySpace.SMEM),   # weight (3,)
            pl.BlockSpec(memory_space=pltpu.MemorySpace.SMEM),   # bias   (1,)
            pl.BlockSpec((3, tile), lambda i: (0, i)),           # x tile
        ],
        out_specs=pl.BlockSpec((1, tile), lambda i: (0, i)),     # lane-dense
        compiler_params=pltpu.CompilerParams(
            dimension_semantics=("parallel",),
        ),
        cost_estimate=cost,
    )(w, b, x_t)

    # Back to the PyTorch contract: (B, 1); padded lanes are discarded here.
    return out[0, :B].reshape(B, 1)


if __name__ == "__main__":
    key = jax.random.PRNGKey(0)
    kx, kw, kb, kx2 = jax.random.split(key, 4)

    # Deterministic parameter init mimicking nn.Linear(3, 1):
    # uniform(-1/sqrt(fan_in), 1/sqrt(fan_in)) with fan_in = 3.
    bound = 1.0 / jnp.sqrt(3.0)
    weight = jax.random.uniform(kw, (1, 3), minval=-bound, maxval=bound,
                                dtype=jnp.float32)
    bias = jax.random.uniform(kb, (1,), minval=-bound, maxval=bound,
                              dtype=jnp.float32)

    # Small batch (pads up to one 128-lane tile).
    batch = 8
    x = jax.random.normal(kx, (batch, 3), dtype=jnp.float32)
    y = dim_reduction(x, weight, bias)
    jax.block_until_ready(y)
    y_ref = jnp.tanh(x @ weight.T + bias)
    assert y.shape == (batch, 1)
    assert jnp.allclose(y, y_ref, atol=1e-5, rtol=1e-5)

    # Non-multiple-of-128 batch with a tiny tile to exercise the grid + tail.
    batch2 = 300
    x2 = jax.random.normal(kx2, (batch2, 3), dtype=jnp.float32)
    y2 = dim_reduction(x2, weight, bias, tile_b=128)
    jax.block_until_ready(y2)
    y2_ref = jnp.tanh(x2 @ weight.T + bias)
    assert y2.shape == (batch2, 1)
    assert jnp.allclose(y2, y2_ref, atol=1e-5, rtol=1e-5)

    print("KERNEL_OK")
</pallas_src>

<mosaic_0001>
module attributes {stable_mosaic.version = 11 : i64} {
  func.func @_dim_reduction_kernel(%arg0: i32, %arg1: memref<3xf32, #tpu.memory_space<smem>>, %arg2: memref<1xf32, #tpu.memory_space<smem>>, %arg3: memref<3x128xf32, #tpu.memory_space<vmem>>, %arg4: memref<1x128xf32, #tpu.memory_space<vmem>>) attributes {dimension_semantics = [#tpu.dimension_semantics<parallel>], iteration_bounds = array<i64: 1>, scalar_prefetch = 0 : i64, scratch_operands = 0 : i64, tpu.core_type = #tpu.core_type<tc>, window_params = [{transform_indices = @transform_0, window_bounds = array<i64: 3>}, {transform_indices = @transform_1, window_bounds = array<i64: 1>}, {transform_indices = @transform_2, window_bounds = array<i64: 3, 128>}, {transform_indices = @transform_3, window_bounds = array<i64: 1, 128>}]} {
    %c0 = arith.constant 0 : index
    %0 = memref.load %arg1[%c0] : memref<3xf32, #tpu.memory_space<smem>>
    %c1 = arith.constant 1 : index
    %1 = memref.load %arg1[%c1] : memref<3xf32, #tpu.memory_space<smem>>
    %c2 = arith.constant 2 : index
    %2 = memref.load %arg1[%c2] : memref<3xf32, #tpu.memory_space<smem>>
    %c0_0 = arith.constant 0 : index
    %3 = memref.load %arg2[%c0_0] : memref<1xf32, #tpu.memory_space<smem>>
    %c0_1 = arith.constant 0 : index
    %c0_2 = arith.constant 0 : index
    %4 = vector.load %arg3[%c0_1, %c0_2] : memref<3x128xf32, #tpu.memory_space<vmem>>, vector<1x128xf32>
    %c1_3 = arith.constant 1 : index
    %c0_4 = arith.constant 0 : index
    %5 = vector.load %arg3[%c1_3, %c0_4] : memref<3x128xf32, #tpu.memory_space<vmem>>, vector<1x128xf32>
    %c2_5 = arith.constant 2 : index
    %c0_6 = arith.constant 0 : index
    %6 = vector.load %arg3[%c2_5, %c0_6] : memref<3x128xf32, #tpu.memory_space<vmem>>, vector<1x128xf32>
    %7 = vector.broadcast %0 : f32 to vector<1x128xf32>
    %8 = arith.mulf %4, %7 : vector<1x128xf32>
    %9 = vector.broadcast %1 : f32 to vector<1x128xf32>
    %10 = arith.mulf %5, %9 : vector<1x128xf32>
    %11 = arith.addf %8, %10 : vector<1x128xf32>
    %12 = vector.broadcast %2 : f32 to vector<1x128xf32>
    %13 = arith.mulf %6, %12 : vector<1x128xf32>
    %14 = arith.addf %11, %13 : vector<1x128xf32>
    %15 = vector.broadcast %3 : f32 to vector<1x128xf32>
    %16 = arith.addf %14, %15 : vector<1x128xf32>
    %17 = math.tanh %16 : vector<1x128xf32>
    %c0_7 = arith.constant 0 : index
    %c0_8 = arith.constant 0 : index
    %18 = vector.load %arg4[%c0_7, %c0_8] : memref<1x128xf32, #tpu.memory_space<vmem>>, vector<1x128xf32>
    tpu.vector_store %arg4[%c0_7, %c0_8], %17 {strides = array<i32>} : memref<1x128xf32, #tpu.memory_space<vmem>>, vector<1x128xf32>,
    return
  }
  func.func @transform_0(%arg0: i32) -> i32 {
    %c0_i32 = arith.constant 0 : i32
    %c0_i32_0 = arith.constant 0 : i32
    return %c0_i32 : i32
  }
  func.func @transform_1(%arg0: i32) -> i32 {
    %c0_i32 = arith.constant 0 : i32
    %c0_i32_0 = arith.constant 0 : i32
    return %c0_i32 : i32
  }
  func.func @transform_2(%arg0: i32) -> (i32, i32) {
    %c0_i32 = arith.constant 0 : i32
    %c0_i32_0 = arith.constant 0 : i32
    return %c0_i32, %arg0 : i32, i32
  }
  func.func @transform_3(%arg0: i32) -> (i32, i32) {
    %c0_i32 = arith.constant 0 : i32
    %c0_i32_0 = arith.constant 0 : i32
    return %c0_i32, %arg0 : i32, i32
  }
}

</mosaic_0001>

<bundles_post_ra>
// kernel: dim_reduction.1
= control target key start
LH: loop header
LB: loop body
LE: loop exit
PB: predicated region body
PF: predicated region fallthrough
CT: control target
= control target key end

     0   :  { %9 = vsyncpa [#allocation4], 0  ;;  %s110_s0 = inlined_call_operand.vmem [shape: f32[3], index: 0, kind: input, shape index: {}]   ;;  %s111_s1 = inlined_call_operand.<no memory space> [shape: f32[1], index: 1, kind: input, shape index: {}]   ;;  %s112_s2 = inlined_call_operand.vmem [shape: f32[3,128], index: 2, kind: input, shape index: {}]   ;;  %s113_s3 = inlined_call_operand.vmem [shape: f32[1,128], index: 3, kind: output, shape index: {}]  }
   0x1   :  { %s16_s14 = sshll.u32 %s110_s0, 4  ;;  %s17_s14 = int_to_ptr.vmem [resolvable:$true] %s16_s14 }
   0x2   :  { %s57_s15 = scalar_lea.vmem %s17_s14, 16  ;;  %p62_p1 = scmp.lt.s32.totalorder %s17_s14, %s17_s14 }
   0x3   :  { %p58_p0 = scmp.ne.s32.totalorder %s17_s14, %s57_s15  ;;  %p63_p2 = scmp.lt.s32.totalorder %s57_s15, %s57_s15 }
   0x5   :  { %p64_p3 = por %p63_p2, %p62_p1 }
   0x7   :  { %p65_p4 = pnand %p64_p3, %p58_p0 }
   0x9   :  { %68 = shalt.err (!%p65_p4)
}
   0xa   :  { %s71_s16 = smov [#allocation3]  }
   0xb   :  { %19 = dma.vmem_to_smem %s17_s14, 16, %s71_s16, [#allocation4]  }
   0xc   :  { %69 = dma.done.wait [#allocation4], 16  }
   0xd   :  { %70 = vsyncadd [#allocation4], 4294967280 }
   0xe   :  { %27 = sfence }
   0xf   :  { %s28_s17 = sld [smem:[#allocation3]]  ;;  %s52_s18 = sld [smem:[#allocation3 + $0x1]]  ;;  %v32_v0 = vld [vmem:[%s112_s2] sm:$0x1]  ;;  %v33_v1 = vld [vmem:[%s112_s2 + $0x1] sm:$0x1]  ;;  %v43_v10 = vstv %s111_s1 }
  0x10   :  { %s53_s19 = sld [smem:[#allocation3 + $0x2]]  ;;  %v34_v2 = vld [vmem:[%s112_s2 + $0x2] sm:$0x1] }
  0x15   :  { %v35_v3 = vstv %s28_s17  ;;  %v37_v4 = vstv %s52_s18 }
  0x16   :  { %v36_v5 = vmul.f32 %v35_v3, %v32_v0  ;;  %v38_v6 = vmul.f32 %v37_v4, %v33_v1  ;;  %v40_v7 = vstv %s53_s19 }
  0x17   :  { %v41_v8 = vmul.f32 %v40_v7, %v34_v2 }
  0x18   :  { %v39_v9 = vadd.f32 %v38_v6, %v36_v5 }
  0x1a   :  { %v42_v11 = vadd.f32 %v41_v8, %v39_v9 }
  0x1c   :  { %v44_v12 = vadd.f32 %v43_v10, %v42_v11 }
  0x1e   :  { %55 = vtanh.f32 %v44_v12 }
  0x28   :  { %v56_v13 = vpop.eup %55 }
  0x29   :  { %46 = vst [vmem:[%s113_s3] sm:$0x1] %v56_v13 }
  0x2a   :  { %51 = vsyncpa [#allocation4], 1 }

</bundles_post_ra>
